<compile_context>
chip_gen: v7x
topology: tpu7x:2x2x1
jax: 0.10.0
libtpu: 0.0.40
codegen_flags: <defaults>
</compile_context>

<pallas_src>
import functools
import numpy as np
import jax
import jax.numpy as jnp
from jax import lax
from jax.experimental import pallas as pl
from jax.experimental.pallas import tpu as pltpu

EPS_BN = 1e-5       # PyTorch BatchNorm default eps
EPS_NORM = 1e-12    # F.normalize default eps


def _round_up(x, m):
    return ((x + m - 1) // m) * m


def _pick_group(b, max_group=8):
    # largest divisor of b that is <= max_group (images per head grid step)
    for g in range(min(b, max_group), 0, -1):
        if b % g == 0:
            return g
    return 1


# ----------------------------------------------------------------------------
# Fused: backbone-stub projection + LinearBlock (fc + BatchNorm1d + ReLU).
#   tokens (T, P) -> [@ proj_w (P, Cb)] -> h (VMEM only, f32)
#                 -> [@ gl_w (Cb, tn) + gl_b] -> BN(train, gamma=1, beta=0)
#                 -> ReLU -> bf16 out
# Grid is column tiles of C_out ("parallel"): BN stats are per-column so the
# tiles are independent -> megacore parallelism on v7x.  tokens / proj_w use
# full-extent blocks (index_map -> 0) and stay resident across the grid.
# ----------------------------------------------------------------------------
def _backbone_linear_bn_relu_kernel(tok_ref, pw_ref, gw_ref, gb_ref, o_ref):
    # (T, Cb) intermediate only ever exists in VMEM, f32.
    # TODO(synk): h is recomputed per column tile; with many column tiles a
    #             cross-tile VMEM scratch (non-parallel grid) would avoid it.
    h = jnp.dot(tok_ref[...], pw_ref[...], preferred_element_type=jnp.float32)
    y = jnp.dot(h.astype(jnp.bfloat16), gw_ref[...],
                preferred_element_type=jnp.float32) + gb_ref[...]
    # training-mode BatchNorm1d over the row (batch) axis, weight=1 / bias=0.
    mean = jnp.mean(y, axis=0, keepdims=True)
    var = jnp.mean((y - mean) ** 2, axis=0, keepdims=True)
    yn = (y - mean) * lax.rsqrt(var + EPS_BN)
    o_ref[...] = jnp.maximum(yn, 0.0).astype(o_ref.dtype)


def pallas_backbone_linear_bn_relu(tokens2d, proj_w, gl_w, gl_b):
    t, p = tokens2d.shape            # p is already lane-aligned by patchify
    p0, cb = proj_w.shape
    cb2, c_out = gl_w.shape
    assert cb == cb2 and p0 <= p

    tok16 = tokens2d.astype(jnp.bfloat16)
    pw16 = proj_w.astype(jnp.bfloat16)
    if p != p0:                      # pad only the tiny weight, never tokens
        pw16 = jnp.pad(pw16, ((0, p - p0), (0, 0)))
    gw16 = gl_w.astype(jnp.bfloat16)
    gb = gl_b.reshape(1, c_out).astype(jnp.float32)

    c_pad = _round_up(c_out, 128)
    tn = min(512, c_pad)             # column tile of C_out
    if c_pad != c_out:               # pad only the tiny weight/bias operands
        gw16 = jnp.pad(gw16, ((0, 0), (0, c_pad - c_out)))
        gb = jnp.pad(gb, ((0, 0), (0, c_pad - c_out)))
    grid = (c_pad // tn,)

    out = pl.pallas_call(
        _backbone_linear_bn_relu_kernel,
        out_shape=jax.ShapeDtypeStruct((t, c_pad), jnp.bfloat16),
        grid_spec=pltpu.PrefetchScalarGridSpec(
            num_scalar_prefetch=0, grid=grid,
            in_specs=[
                pl.BlockSpec((t, p), lambda j: (0, 0)),      # tokens (resident)
                pl.BlockSpec((p, cb), lambda j: (0, 0)),     # proj_w (resident)
                pl.BlockSpec((cb, tn), lambda j: (0, j)),    # gl_w column tile
                pl.BlockSpec((1, tn), lambda j: (0, j)),     # gl_b column tile
            ],
            out_specs=pl.BlockSpec((t, tn), lambda j: (0, j)),
        ),
        compiler_params=pltpu.CompilerParams(
            dimension_semantics=("parallel",)),
    )(tok16, pw16, gw16, gb)
    return out if c_pad == c_out else out[:, :c_out]


# ----------------------------------------------------------------------------
# Fused Head kernel (grid over GROUPS of Bi images): GEM edge extraction +
# 2-layer GNN + classification.  Crop features arrive as a sublane-dense
# (Bi, n*d, C) bf16 slab; all weight matmuls fold Bi into the row dimension.
# Weights are shared blocks (index_map -> 0) so they stay VMEM-resident.
# ----------------------------------------------------------------------------
def _head_kernel(crop_ref, g_ref, gem_w_ref, gem_b_ref,
                 wn1_ref, e1_ref, wn2_ref, e2_ref, sc_ref, cl_ref, *, n, d):
    bi, nd, c = crop_ref.shape
    crop = crop_ref[...].astype(jnp.float32)            # (Bi, n*d, C)
    g = g_ref[...].astype(jnp.float32)                  # (Bi, 1, C)

    crop4 = crop.reshape(bi, n, d, c)                   # (Bi, n, D, C)
    node = jnp.mean(crop4, axis=2)                      # (Bi, n, C)

    # --- GEM stub: pairwise-product mean over tokens, then linear projection.
    # TODO(synk): GEM (FAM/ARM cross-attention) definition not provided;
    # simplified pairwise-product edge extractor with identical output shape.
    # Vectorized over crops; the tiny static loop over the Bi grouped images
    # keeps every intermediate rank <= 4 (VPU work, no concat relayouts).
    feat = crop4 + g.reshape(bi, 1, 1, c)                # (Bi, n, D, C)
    pm_imgs = []
    for bidx in range(bi):
        fb = feat[bidx]                                  # (n, D, C)
        pm_imgs.append(jnp.mean(fb[:, None, :, :] * fb[None, :, :, :], axis=2))
    pm = jnp.stack(pm_imgs, axis=0)                      # (Bi, n, n, C)
    edge = (jnp.dot(pm.reshape(bi * n * n, c).astype(jnp.bfloat16),
                    gem_w_ref[...], preferred_element_type=jnp.float32)
            + gem_b_ref[...]).reshape(bi, n * n, c)      # (Bi, n*n, C)

    # --- 2-layer GNN (each image independent; matmul rows batched over Bi) --
    def bn_rows(y):
        # fresh training-mode BatchNorm1d(num_rows) on a (1, rows, C) tensor
        # with weight=1 / bias=0 == per-row normalization over the C axis.
        m = jnp.mean(y, axis=-1, keepdims=True)
        v = jnp.mean((y - m) ** 2, axis=-1, keepdims=True)
        return (y - m) * lax.rsqrt(v + EPS_BN)

    def block(x, edge, wn_ref, e_ref):
        res = x                                          # (Bi, n, C)
        y = jnp.dot(x.reshape(bi * n, c).astype(jnp.bfloat16), wn_ref[...],
                    preferred_element_type=jnp.float32).reshape(bi, n, 4 * c)
        vix = y[..., 0 * c:1 * c]        # A(x) -> picked by end node i
        vjx = y[..., 1 * c:2 * c]        # B(x) -> picked by start node j
        ujx = y[..., 2 * c:3 * c]        # V(x) -> broadcast along j
        uix = y[..., 3 * c:4 * c]        # U(x)
        ee = jnp.dot(edge.reshape(bi * n * n, c).astype(jnp.bfloat16),
                     e_ref[...],
                     preferred_element_type=jnp.float32).reshape(bi, n, n, c)
        msg = vix[:, :, None, :] + vjx[:, None, :, :] + ee   # (Bi, n, n, C)
        edge = edge + jnp.maximum(bn_rows(msg.reshape(bi, n * n, c)), 0.0)

        eact = jax.nn.sigmoid(edge).reshape(bi, n, n, c)
        emax = jnp.max(eact, axis=2, keepdims=True)          # softmax over j
        eexp = jnp.exp(eact - emax)
        esm = eexp * pl.reciprocal(jnp.sum(eexp, axis=2, keepdims=True),
                                   approx=True)
        agg = jnp.sum(esm * ujx[:, None, :, :], axis=2)      # (Bi, n, C)
        x_new = uix + agg * (1.0 / n)
        x_new = jnp.maximum(res + bn_rows(x_new), 0.0)
        return x_new, edge

    x = node
    x, edge = block(x, edge, wn1_ref, e1_ref)
    x, edge = block(x, edge, wn2_ref, e2_ref)

    # --- classification (sc already relu+normalized+transposed+lane-padded) -
    xn = x * lax.rsqrt(jnp.maximum(jnp.sum(x * x, axis=-1, keepdims=True),
                                   EPS_NORM * EPS_NORM))
    cl = jnp.dot(xn.reshape(bi * n, c).astype(jnp.bfloat16), sc_ref[...],
                 preferred_element_type=jnp.float32)
    cl_ref[...] = cl.reshape(bi, n, cl.shape[-1])


def _prep_head_params(params, num_classes, nc_pad):
    # fuse the four node-side weights of each GNN block into one wide matrix
    wn1 = jnp.concatenate([params['A1'], params['B1'],
                           params['V1'], params['U1']], axis=1).astype(jnp.bfloat16)
    wn2 = jnp.concatenate([params['A2'], params['B2'],
                           params['V2'], params['U2']], axis=1).astype(jnp.bfloat16)
    e1 = params['E1'].astype(jnp.bfloat16)
    e2 = params['E2'].astype(jnp.bfloat16)
    gem_w = params['gem_w'].astype(jnp.bfloat16)
    gem_b = params['gem_b'].reshape(1, -1).astype(jnp.float32)
    # relu + L2-normalize + transpose + lane-pad the class anchors outside the
    # kernel (tiny, one-time) so the kernel does a transpose-free, lane-dense
    # matmul.
    sc = jnp.maximum(params['sc'], 0.0)
    scn = sc * lax.rsqrt(jnp.maximum(jnp.sum(sc * sc, axis=-1, keepdims=True),
                                     EPS_NORM * EPS_NORM))
    sc_t = jnp.pad(scn.T, ((0, 0), (0, nc_pad - num_classes))).astype(jnp.bfloat16)
    return gem_w, gem_b, wn1, e1, wn2, e2, sc_t


def pallas_head(crop_slab, g, params, num_classes, n_crops, n_tok):
    # crop_slab: (B, n*d, C) bf16 sublane-dense slab; g: (B, 1, C) bf16
    b, nd, c = crop_slab.shape
    assert nd == n_crops * n_tok
    nc_pad = _round_up(num_classes, 128)
    gem_w, gem_b, wn1, e1, wn2, e2, sc_t = _prep_head_params(
        params, num_classes, nc_pad)
    bi = _pick_group(b, max_group=8)          # images per grid step
    kern = functools.partial(_head_kernel, n=n_crops, d=n_tok)
    out = pl.pallas_call(
        kern,
        out_shape=jax.ShapeDtypeStruct((b, n_crops, nc_pad), jnp.float32),
        grid_spec=pltpu.PrefetchScalarGridSpec(
            num_scalar_prefetch=0, grid=(b // bi,),
            in_specs=[
                pl.BlockSpec((bi, nd, c), lambda i: (i, 0, 0)),     # crop slab
                pl.BlockSpec((bi, 1, c), lambda i: (i, 0, 0)),      # g
                pl.BlockSpec((c, c), lambda i: (0, 0)),             # gem_w
                pl.BlockSpec((1, c), lambda i: (0, 0)),             # gem_b
                pl.BlockSpec((c, 4 * c), lambda i: (0, 0)),         # wn1
                pl.BlockSpec((c, c), lambda i: (0, 0)),             # E1
                pl.BlockSpec((c, 4 * c), lambda i: (0, 0)),         # wn2
                pl.BlockSpec((c, c), lambda i: (0, 0)),             # E2
                pl.BlockSpec((c, nc_pad), lambda i: (0, 0)),        # sc^T
            ],
            out_specs=pl.BlockSpec((bi, n_crops, nc_pad), lambda i: (i, 0, 0)),
        ),
        compiler_params=pltpu.CompilerParams(
            dimension_semantics=("parallel",)),
    )(crop_slab, g, gem_w, gem_b, wn1, e1, wn2, e2, sc_t)
    return out[:, :, :num_classes]


# ----------------------------------------------------------------------------
# Glue (plain JAX): patchify, parameter init, MEFARG forward
# ----------------------------------------------------------------------------
def patchify(imgs, patch=8, lane=128):
    # NCHW -> (B, num_patches, 3*patch*patch) token layout; the feature dim is
    # lane-aligned as part of the same transpose copy so in-kernel matmul K
    # is always a multiple of 128 (no separate activation-pad pass).
    b, ch, h, w = imgs.shape
    hp, wp = h // patch, w // patch
    t = imgs.reshape(b, ch, hp, patch, wp, patch)
    t = t.transpose(0, 2, 4, 1, 3, 5).reshape(b, hp * wp, ch * patch * patch)
    pd = ch * patch * patch
    pd_pad = _round_up(pd, lane)
    if pd_pad != pd:
        t = jnp.pad(t, ((0, 0), (0, 0), (0, pd_pad - pd)))
    return t


def init_params(key, patch_dim, c_backbone, c_out, num_classes):
    ks = list(jax.random.split(key, 16))
    p = {}
    # TODO(synk): stand-in weights for the resnet101/resnet152 backbones.
    p['backbone1_w'] = 0.02 * jax.random.normal(ks[0], (patch_dim, c_backbone))
    p['backbone2_w'] = 0.02 * jax.random.normal(ks[1], (patch_dim, c_backbone))
    # global_linear1/2 (LinearBlock fc weight stored as (C_in, C_out))
    p['gl1_w'] = jax.random.normal(ks[2], (c_backbone, c_out)) / np.sqrt(c_backbone)
    p['gl1_b'] = jnp.zeros((c_out,), jnp.float32)
    p['gl2_w'] = jax.random.normal(ks[3], (c_backbone, c_out)) / np.sqrt(c_backbone)
    p['gl2_b'] = jnp.zeros((c_out,), jnp.float32)
    # GEM stub edge projection
    p['gem_w'] = jax.random.normal(ks[4], (c_out, c_out)) / np.sqrt(c_out)
    p['gem_b'] = jnp.zeros((c_out,), jnp.float32)
    # GNN linears: init_weights_linear -> N(0, sqrt(2/dim_in)), no bias,
    # stored pre-transposed as (C_in, C_out)
    scale = np.sqrt(2.0 / c_out)
    names = ['U1', 'V1', 'A1', 'B1', 'E1', 'U2', 'V2', 'A2', 'B2', 'E2']
    for i, nm in enumerate(names):
        p[nm] = scale * jax.random.normal(ks[5 + i], (c_out, c_out))
    # Head.sc, xavier_uniform
    bound = float(np.sqrt(6.0 / (num_classes + c_out)))
    p['sc'] = jax.random.uniform(ks[15], (num_classes, c_out),
                                 minval=-bound, maxval=bound)
    return {k: v.astype(jnp.float32) for k, v in p.items()}


def mefarg_forward(params, batch_images, cropped_images, patch=8):
    # --- backbone2 + global_linear2 on whole images (single fused kernel) ---
    tokens2 = patchify(batch_images, patch)                       # (B, N2, Pp)
    b, n2, pd = tokens2.shape
    f2 = pallas_backbone_linear_bn_relu(
        tokens2.reshape(b * n2, pd),
        params['backbone2_w'], params['gl2_w'], params['gl2_b'])  # bf16
    c_out = f2.shape[-1]
    initial_features = f2.reshape(b, n2, c_out)                   # (B, N2, C)

    # --- merge crops (contiguous per image, matching image_indices order) ---
    all_crops = jnp.concatenate(
        [jnp.concatenate(crops, axis=0) for crops in cropped_images], axis=0)
    counts = [sum(int(c.shape[0]) for c in crops) for crops in cropped_images]
    # TODO(synk): ragged per-image crop counts would need per-image launches;
    # all images carry the same crop count here so the head is batched.
    assert len(set(counts)) == 1
    n_crops = counts[0]

    # --- backbone1 + global_linear1 on all crops (single fused kernel) ---
    tokens1 = patchify(all_crops, patch)                          # (T, N1, Pp)
    t_all, n1, _ = tokens1.shape
    f1 = pallas_backbone_linear_bn_relu(
        tokens1.reshape(t_all * n1, pd),
        params['backbone1_w'], params['gl1_w'], params['gl1_b'])  # bf16

    # --- Head: batched grid over image groups, GEM + GNN + classification ---
    crop_slab = f1.reshape(b, n_crops * n1, c_out)                # (B, n*d, C)
    g = (initial_features.astype(jnp.float32).mean(axis=1, keepdims=True)
         .astype(jnp.bfloat16))                                   # (B, 1, C)
    num_classes = params['sc'].shape[0]
    cl = pallas_head(crop_slab, g, params, num_classes, n_crops, n1)
    return [cl[i] for i in range(b)]


# ----------------------------------------------------------------------------
if __name__ == "__main__":
    key = jax.random.PRNGKey(0)
    k_par, k_img, k_crop = jax.random.split(key, 3)

    B = 2
    H = W = 16
    PATCH = 8
    C_BACKBONE = 512                 # stands in for the 2048 resnet channels
    C_OUT = C_BACKBONE // 4          # //4 as in MEFARG for resnet backbones
    NUM_CLASSES = 10
    PATCH_DIM = 3 * PATCH * PATCH    # 192 (lane-padded to 256 inside patchify)

    params = init_params(k_par, PATCH_DIM, C_BACKBONE, C_OUT, NUM_CLASSES)

    batch_images = jax.random.normal(k_img, (B, 3, H, W), jnp.float32)

    # 2 crop groups per image, 2 crops per group -> 4 crops / image
    crop_keys = jax.random.split(k_crop, B * 2)
    cropped_images = []
    ki = 0
    for _ in range(B):
        groups = []
        for _ in range(2):
            groups.append(jax.random.normal(crop_keys[ki], (2, 3, H, W),
                                            jnp.float32))
            ki += 1
        cropped_images.append(groups)

    outs = mefarg_forward(params, batch_images, cropped_images, patch=PATCH)
    outs = [jax.block_until_ready(o) for o in outs]

    assert len(outs) == B
    for o in outs:
        assert o.shape == (4, NUM_CLASSES)          # 4 crops per image
        assert o.dtype == jnp.float32
        assert bool(jnp.all(jnp.isfinite(o)))
    print("KERNEL_OK")
</pallas_src>

<mosaic_0001>
module attributes {stable_mosaic.version = 11 : i64} {
  func.func @_backbone_linear_bn_relu_kernel(%arg0: i32, %arg1: memref<8x256xbf16, #tpu.memory_space<vmem>>, %arg2: memref<256x512xbf16, #tpu.memory_space<vmem>>, %arg3: memref<512x128xbf16, #tpu.memory_space<vmem>>, %arg4: memref<1x128xf32, #tpu.memory_space<vmem>>, %arg5: memref<8x128xbf16, #tpu.memory_space<vmem>>) attributes {dimension_semantics = [#tpu.dimension_semantics<parallel>], iteration_bounds = array<i64: 1>, scalar_prefetch = 0 : i64, scratch_operands = 0 : i64, tpu.core_type = #tpu.core_type<tc>, window_params = [{pipeline_mode = #tpu.pipeline_mode<synchronous>, transform_indices = @transform_0, window_bounds = array<i64: 8, 256>}, {pipeline_mode = #tpu.pipeline_mode<synchronous>, transform_indices = @transform_1, window_bounds = array<i64: 256, 512>}, {transform_indices = @transform_2, window_bounds = array<i64: 512, 128>}, {transform_indices = @transform_3, window_bounds = array<i64: 1, 128>}, {transform_indices = @transform_4, window_bounds = array<i64: 8, 128>}]} {
    %c0 = arith.constant 0 : index
    %c0_0 = arith.constant 0 : index
    %0 = vector.load %arg1[%c0, %c0_0] : memref<8x256xbf16, #tpu.memory_space<vmem>>, vector<8x256xbf16>
    %c0_1 = arith.constant 0 : index
    %c0_2 = arith.constant 0 : index
    %1 = vector.load %arg2[%c0_1, %c0_2] : memref<256x512xbf16, #tpu.memory_space<vmem>>, vector<256x512xbf16>
    %cst = arith.constant dense<0.000000e+00> : vector<8x512xf32>
    %2 = tpu.matmul %0, %1, %cst {dimension_numbers = #tpu.dot_dimension_numbers<[1], [0], [0], [1], [0, 0, 1, 1], [], []>} : vector<8x256xbf16>, vector<256x512xbf16>, vector<8x512xf32> -> vector<8x512xf32>
    %3 = arith.truncf %2 : vector<8x512xf32> to vector<8x512xbf16>
    %c0_3 = arith.constant 0 : index
    %c0_4 = arith.constant 0 : index
    %4 = vector.load %arg3[%c0_3, %c0_4] : memref<512x128xbf16, #tpu.memory_space<vmem>>, vector<512x128xbf16>
    %cst_5 = arith.constant dense<0.000000e+00> : vector<8x128xf32>
    %5 = tpu.matmul %3, %4, %cst_5 {dimension_numbers = #tpu.dot_dimension_numbers<[1], [0], [0], [1], [0, 0, 1, 1], [], []>} : vector<8x512xbf16>, vector<512x128xbf16>, vector<8x128xf32> -> vector<8x128xf32>
    %c0_6 = arith.constant 0 : index
    %c0_7 = arith.constant 0 : index
    %6 = vector.load %arg4[%c0_6, %c0_7] : memref<1x128xf32, #tpu.memory_space<vmem>>, vector<1x128xf32>
    %7 = vector.broadcast %6 : vector<1x128xf32> to vector<8x128xf32>
    %8 = arith.addf %5, %7 : vector<8x128xf32>
    %cst_8 = arith.constant dense<0.000000e+00> : vector<128xf32>
    %9 = vector.multi_reduction <add>, %8, %cst_8 [0] : vector<8x128xf32> to vector<128xf32>
    %10 = vector.shape_cast %9 : vector<128xf32> to vector<1x128xf32>
    %cst_9 = arith.constant 8.000000e+00 : f32
    %11 = vector.broadcast %cst_9 : f32 to vector<1x128xf32>
    %12 = arith.divf %10, %11 : vector<1x128xf32>
    %13 = vector.broadcast %12 : vector<1x128xf32> to vector<8x128xf32>
    %14 = arith.subf %8, %13 : vector<8x128xf32>
    %15 = arith.mulf %14, %14 : vector<8x128xf32>
    %cst_10 = arith.constant dense<0.000000e+00> : vector<128xf32>
    %16 = vector.multi_reduction <add>, %15, %cst_10 [0] : vector<8x128xf32> to vector<128xf32>
    %17 = vector.shape_cast %16 : vector<128xf32> to vector<1x128xf32>
    %cst_11 = arith.constant 8.000000e+00 : f32
    %18 = vector.broadcast %cst_11 : f32 to vector<1x128xf32>
    %19 = arith.divf %17, %18 : vector<1x128xf32>
    %20 = vector.broadcast %12 : vector<1x128xf32> to vector<8x128xf32>
    %21 = arith.subf %8, %20 : vector<8x128xf32>
    %cst_12 = arith.constant 9.99999974E-6 : f32
    %22 = vector.broadcast %cst_12 : f32 to vector<1x128xf32>
    %23 = arith.addf %19, %22 : vector<1x128xf32>
    %24 = math.rsqrt %23 : vector<1x128xf32>
    %25 = vector.broadcast %24 : vector<1x128xf32> to vector<8x128xf32>
    %26 = arith.mulf %21, %25 : vector<8x128xf32>
    %cst_13 = arith.constant 0.000000e+00 : f32
    %27 = vector.broadcast %cst_13 : f32 to vector<8x128xf32>
    %28 = arith.maximumf %26, %27 : vector<8x128xf32>
    %29 = arith.truncf %28 : vector<8x128xf32> to vector<8x128xbf16>
    %c0_14 = arith.constant 0 : index
    %c0_15 = arith.constant 0 : index
    %30 = vector.load %arg5[%c0_14, %c0_15] : memref<8x128xbf16, #tpu.memory_space<vmem>>, vector<8x128xbf16>
    tpu.vector_store %arg5[%c0_14, %c0_15], %29 {strides = array<i32>} : memref<8x128xbf16, #tpu.memory_space<vmem>>, vector<8x128xbf16>,
    return
  }
  func.func @transform_0(%arg0: i32) -> (i32, i32) {
    %c0_i32 = arith.constant 0 : i32
    %c0_i32_0 = arith.constant 0 : i32
    %c0_i32_1 = arith.constant 0 : i32
    return %c0_i32, %c0_i32_0 : i32, i32
  }
  func.func @transform_1(%arg0: i32) -> (i32, i32) {
    %c0_i32 = arith.constant 0 : i32
    %c0_i32_0 = arith.constant 0 : i32
    %c0_i32_1 = arith.constant 0 : i32
    return %c0_i32, %c0_i32_0 : i32, i32
  }
  func.func @transform_2(%arg0: i32) -> (i32, i32) {
    %c0_i32 = arith.constant 0 : i32
    %c0_i32_0 = arith.constant 0 : i32
    return %c0_i32, %arg0 : i32, i32
  }
  func.func @transform_3(%arg0: i32) -> (i32, i32) {
    %c0_i32 = arith.constant 0 : i32
    %c0_i32_0 = arith.constant 0 : i32
    return %c0_i32, %arg0 : i32, i32
  }
  func.func @transform_4(%arg0: i32) -> (i32, i32) {
    %c0_i32 = arith.constant 0 : i32
    %c0_i32_0 = arith.constant 0 : i32
    return %c0_i32, %arg0 : i32, i32
  }
}

</mosaic_0001>

<bundles_post_ra>
// kernel: tpu_custom_call.1
= control target key start
LH: loop header
LB: loop body
LE: loop exit
PB: predicated region body
PF: predicated region fallthrough
CT: control target
= control target key end

     0   :  { %9 = vsyncpa [#allocation3], 0  ;;  %s1379_s0 = inlined_call_operand.hbm [shape: bf16[8,256], index: 0, kind: input, shape index: {}]   ;;  %s1380_s1 = inlined_call_operand.hbm [shape: bf16[256,512], index: 1, kind: input, shape index: {}]   ;;  %s1381_s2 = inlined_call_operand.hbm [shape: bf16[512,128], index: 2, kind: input, shape index: {}]   ;;  %s1382_s3 = inlined_call_operand.vmem [shape: f32[1,128], index: 3, kind: input, shape index: {}]   ;;  %s1383_s4 = inlined_call_operand.hbm [shape: bf16[8,128], index: 4, kind: output, shape index: {}]  }
   0x1   :  { %10 = vsyncpa [#allocation6], 0 }
   0x2   :  { %11 = vsyncpa [#allocation4], 0  ;;  %s1295_s15 = smov [#allocation5]   ;;  %s1201_s19 = scalar_lea.hbm %s1380_s1, 8192 }
   0x3   :  { %s27_s16 = sshll.u32 %s1295_s15, 4  ;;  %p1202_p0 = scmp.ne.s32.totalorder %s1380_s1, %s1201_s19  ;;  %s28_s16 = int_to_ptr.vmem [resolvable:$true] %s27_s16 }
   0x4   :  { %p1205_p1 = scmp.lt.u32.totalorder %s1201_s19, %s1380_s1 }
   0x6   :  { %p1207_p2 = pnand %p1205_p1, %p1202_p0 }
   0x8   :  { %1210 = shalt.err (!%p1207_p2)
}
   0x9   :  { %s1211_s24 = scalar_lea.vmem %s28_s16, 8192  ;;  %p1216_p4 = scmp.lt.s32.totalorder %s28_s16, %s28_s16 }
   0xa   :  { %p1212_p3 = scmp.ne.s32.totalorder %s28_s16, %s1211_s24  ;;  %p1217_p5 = scmp.lt.s32.totalorder %s1211_s24, %s1211_s24 }
   0xc   :  { %p1218_p6 = por %p1217_p5, %p1216_p4 }
   0xe   :  { %p1219_p7 = pnand %p1218_p6, %p1212_p3 }
  0x10   :  { %1222 = shalt.err (!%p1219_p7)
}
  0x11   :  { %s1296_s25 = smov 256   ;;  %s1297_s26 = smov 16  }
  0x12   :  { %33 = dma.hbm_to_vmem [thread:$0]  %s1380_s1, 8192, %s28_s16, [#allocation6], %s1296_s25, %s1296_s25, %s1297_s26  }
  0x13   :  { %s1298_s29 = smov [#allocation2]   ;;  %s1299_s5 = smov [#allocation7]  }
  0x14   :  { %s18_s30 = sshll.u32 %s1298_s29, 4  ;;  %s39_s6 = sshll.u32 %s1299_s5, 4  ;;  %s19_s30 = int_to_ptr.vmem [resolvable:$true] %s18_s30  ;;  %s40_s6 = int_to_ptr.vmem [resolvable:$true] %s39_s6 }
  0x15   :  { %s1223_s9 = scalar_lea.hbm %s1379_s0, 128 }
  0x16   :  { %p1224_p8 = scmp.ne.s32.totalorder %s1379_s0, %s1223_s9  ;;  %p1227_p9 = scmp.lt.u32.totalorder %s1223_s9, %s1379_s0 }
  0x18   :  { %p1229_p10 = pnand %p1227_p9, %p1224_p8 }
  0x1a   :  { %1232 = shalt.err (!%p1229_p10)
}
  0x1b   :  { %s1233_s1 = scalar_lea.vmem %s19_s30, 128  ;;  %p1238_p12 = scmp.lt.s32.totalorder %s19_s30, %s19_s30 }
  0x1c   :  { %p1234_p11 = scmp.ne.s32.totalorder %s19_s30, %s1233_s1  ;;  %p1239_p13 = scmp.lt.s32.totalorder %s1233_s1, %s1233_s1 }
  0x1e   :  { %p1240_p0 = por %p1239_p13, %p1238_p12 }
  0x20   :  { %p1241_p1 = pnand %p1240_p0, %p1234_p11 }
  0x22   :  { %1244 = shalt.err (!%p1241_p1)
}
  0x23   :  { %21 = dma.hbm_to_vmem [thread:$0]  %s1379_s0, 128, %s19_s30, [#allocation3]  }
  0x24   :  { %s1245_s18 = scalar_lea.hbm %s1381_s2, 4096 }
  0x25   :  { %p1246_p2 = scmp.ne.s32.totalorder %s1381_s2, %s1245_s18  ;;  %p1249_p3 = scmp.lt.u32.totalorder %s1245_s18, %s1381_s2 }
  0x27   :  { %p1251_p4 = pnand %p1249_p3, %p1246_p2 }
  0x29   :  { %1254 = shalt.err (!%p1251_p4)
}
  0x2a   :  { %s1255_s23 = scalar_lea.vmem %s40_s6, 4096  ;;  %p1260_p6 = scmp.lt.s32.totalorder %s40_s6, %s40_s6 }
  0x2b   :  { %p1256_p5 = scmp.ne.s32.totalorder %s40_s6, %s1255_s23  ;;  %p1261_p7 = scmp.lt.s32.totalorder %s1255_s23, %s1255_s23 }
  0x2d   :  { %p1262_p8 = por %p1261_p7, %p1260_p6 }
  0x2f   :  { %p1263_p9 = pnand %p1262_p8, %p1256_p5 }
  0x31   :  { %1266 = shalt.err (!%p1263_p9)
}
  0x32   :  { %s1300_s0 = smov 64   ;;  %s1301_s24 = smov 4  }
  0x33   :  { %45 = dma.hbm_to_vmem [thread:$0]  %s1381_s2, 4096, %s40_s6, [#allocation6], %s1300_s0, %s1300_s0, %s1301_s24  }
  0x34   :  { %1289 = dma.done.wait [#allocation3], 128  }
  0x35   :  { %1290 = vsyncadd [#allocation3], 4294967168 }
  0x36   :  { %1291 = dma.done.wait [#allocation6], 12288  }
  0x37   :  { %1292 = vsyncadd [#allocation6], 4294955008  ;;  %v1069_v0 = vld [vmem:[#allocation5 + $0x4] ss:$16 sps:$4 sm:$0xff]   ;;  %v1071_v1 = vld [vmem:[#allocation5 + $0xc] ss:$16 sps:$4 sm:$0xff]  }
  0x38   :  { %450 = vmatprep.subr.bf16.mxu0 %v1069_v0  ;;  %v1073_v2 = vld [vmem:[#allocation5] ss:$16 sps:$4 sm:$0xff]   ;;  %v1074_v3 = vld [vmem:[#allocation5 + $0x8] ss:$16 sps:$4 sm:$0xff]   ;;  %491 = vmatprep.subr.bf16.mxu1 %v1071_v1  ;;  %v1075_v4 = vld [vmem:[#allocation5 + $0x24] ss:$16 sps:$4 sm:$0xff]  }
  0x39   :  { %451 = vmatpush1.bf16.msra.mxu0 %v1073_v2  ;;  %492 = vmatpush1.bf16.msra.mxu1 %v1074_v3  ;;  %v1077_v5 = vld [vmem:[#allocation5 + $0x2c] ss:$16 sps:$4 sm:$0xff]   ;;  %v1079_v6 = vld [vmem:[#allocation5 + $0x20] ss:$16 sps:$4 sm:$0xff]   ;;  %v1080_v7 = vld [vmem:[#allocation5 + $0x28] ss:$16 sps:$4 sm:$0xff]  }
  0x3a   :  { %452 = vmatprep.subr.bf16.mxu0 %v1075_v4  ;;  %493 = vmatprep.subr.bf16.mxu1 %v1077_v5  ;;  %v1081_v8 = vld [vmem:[#allocation5 + $0x44] ss:$16 sps:$4 sm:$0xff]   ;;  %v1083_v9 = vld [vmem:[#allocation5 + $0x4c] ss:$16 sps:$4 sm:$0xff]   ;;  %v1085_v10 = vld [vmem:[#allocation5 + $0x40] ss:$16 sps:$4 sm:$0xff]  }
  0x3b   :  { %v1086_v11 = vld [vmem:[#allocation5 + $0x48] ss:$16 sps:$4 sm:$0xff]   ;;  %v1087_v12 = vld [vmem:[#allocation5 + $0x64] ss:$16 sps:$4 sm:$0xff]   ;;  %v1089_v13 = vld [vmem:[#allocation5 + $0x6c] ss:$16 sps:$4 sm:$0xff]  }
  0x3c   :  { %v1091_v14 = vld [vmem:[#allocation5 + $0x60] ss:$16 sps:$4 sm:$0xff]   ;;  %v1092_v15 = vld [vmem:[#allocation5 + $0x68] ss:$16 sps:$4 sm:$0xff]   ;;  %v1093_v16 = vld [vmem:[#allocation5 + $0x84] ss:$16 sps:$4 sm:$0xff]  }
  0x3d   :  { %453 = vmatpush1.bf16.msra.mxu0 %v1079_v6  ;;  %494 = vmatpush1.bf16.msra.mxu1 %v1080_v7  ;;  %v1095_v17 = vld [vmem:[#allocation5 + $0x8c] ss:$16 sps:$4 sm:$0xff]   ;;  %v1097_v18 = vld [vmem:[#allocation5 + $0x80] ss:$16 sps:$4 sm:$0xff]   ;;  %v1098_v19 = vld [vmem:[#allocation5 + $0x88] ss:$16 sps:$4 sm:$0xff]  }
  0x3e   :  { %454 = vmatprep.subr.bf16.mxu0 %v1081_v8  ;;  %495 = vmatprep.subr.bf16.mxu1 %v1083_v9  ;;  %v1099_v20 = vld [vmem:[#allocation5 + $0xa4] ss:$16 sps:$4 sm:$0xff]   ;;  %v1101_v21 = vld [vmem:[#allocation5 + $0xac] ss:$16 sps:$4 sm:$0xff]   ;;  %v1103_v22 = vld [vmem:[#allocation5 + $0xa0] ss:$16 sps:$4 sm:$0xff]  }
  0x3f   :  { %v1104_v23 = vld [vmem:[#allocation5 + $0xa8] ss:$16 sps:$4 sm:$0xff]   ;;  %v1105_v24 = vld [vmem:[#allocation5 + $0xc4] ss:$16 sps:$4 sm:$0xff]   ;;  %v1107_v25 = vld [vmem:[#allocation5 + $0xcc] ss:$16 sps:$4 sm:$0xff]  }
  0x40   :  { %v1109_v26 = vld [vmem:[#allocation5 + $0xc0] ss:$16 sps:$4 sm:$0xff]   ;;  %v1110_v27 = vld [vmem:[#allocation5 + $0xc8] ss:$16 sps:$4 sm:$0xff]   ;;  %v1111_v28 = vld [vmem:[#allocation5 + $0xe4] ss:$16 sps:$4 sm:$0xff]  }
  0x41   :  { %455 = vmatpush1.bf16.msra.mxu0 %v1085_v10  ;;  %496 = vmatpush1.bf16.msra.mxu1 %v1086_v11  ;;  %v1113_v29 = vld [vmem:[#allocation5 + $0xec] ss:$16 sps:$4 sm:$0xff]   ;;  %v1115_v30 = vld [vmem:[#allocation5 + $0xe0] ss:$16 sps:$4 sm:$0xff]   ;;  %v1116_v31 = vld [vmem:[#allocation5 + $0xe8] ss:$16 sps:$4 sm:$0xff]  }
  0x42   :  { %456 = vmatprep.subr.bf16.mxu0 %v1087_v12  ;;  %497 = vmatprep.subr.bf16.mxu1 %v1089_v13  ;;  %v1117_v32 = vld [vmem:[#allocation5 + $0x104] ss:$16 sps:$4 sm:$0xff]   ;;  %v1119_v33 = vld [vmem:[#allocation5 + $0x10c] ss:$16 sps:$4 sm:$0xff]   ;;  %v1121_v34 = vld [vmem:[#allocation5 + $0x100] ss:$16 sps:$4 sm:$0xff]  }
  0x43   :  { %v1122_v35 = vld [vmem:[#allocation5 + $0x108] ss:$16 sps:$4 sm:$0xff]   ;;  %v1123_v36 = vld [vmem:[#allocation5 + $0x124] ss:$16 sps:$4 sm:$0xff]   ;;  %v1125_v37 = vld [vmem:[#allocation5 + $0x12c] ss:$16 sps:$4 sm:$0xff]  }
  0x44   :  { %v1127_v38 = vld [vmem:[#allocation5 + $0x120] ss:$16 sps:$4 sm:$0xff]   ;;  %v1128_v39 = vld [vmem:[#allocation5 + $0x128] ss:$16 sps:$4 sm:$0xff]   ;;  %v1129_v40 = vld [vmem:[#allocation5 + $0x144] ss:$16 sps:$4 sm:$0xff]  }
  0x45   :  { %457 = vmatpush1.bf16.msra.mxu0 %v1091_v14  ;;  %498 = vmatpush1.bf16.msra.mxu1 %v1092_v15  ;;  %v1131_v41 = vld [vmem:[#allocation5 + $0x14c] ss:$16 sps:$4 sm:$0xff]   ;;  %v1133_v42 = vld [vmem:[#allocation5 + $0x140] ss:$16 sps:$4 sm:$0xff]   ;;  %v1134_v43 = vld [vmem:[#allocation5 + $0x148] ss:$16 sps:$4 sm:$0xff]  }
  0x46   :  { %458 = vmatprep.subr.bf16.mxu0 %v1093_v16  ;;  %499 = vmatprep.subr.bf16.mxu1 %v1095_v17  ;;  %v1135_v44 = vld [vmem:[#allocation5 + $0x164] ss:$16 sps:$4 sm:$0xff]   ;;  %v1137_v45 = vld [vmem:[#allocation5 + $0x16c] ss:$16 sps:$4 sm:$0xff]   ;;  %v1139_v46 = vld [vmem:[#allocation5 + $0x160] ss:$16 sps:$4 sm:$0xff]  }
  0x47   :  { %v58_v47 = vld [vmem:[#allocation2] sm:$0xff]  ;;  %v1141_v50 = vld [vmem:[#allocation5 + $0x184] ss:$16 sps:$4 sm:$0xff]   ;;  %v1145_v52 = vld [vmem:[#allocation5 + $0x180] ss:$16 sps:$4 sm:$0xff]  }
  0x48   :  { %v1140_v48 = vld [vmem:[#allocation5 + $0x168] ss:$16 sps:$4 sm:$0xff]   ;;  %v919_v49 = vcombine.high %v58_v47, %v58_v47  ;;  %v1143_v51 = vld [vmem:[#allocation5 + $0x18c] ss:$16 sps:$4 sm:$0xff]   ;;  %v1147_v54 = vld [vmem:[#allocation5 + $0x1a4] ss:$16 sps:$4 sm:$0xff]   ;;  %v918_v5 = vcombine.low %v58_v47, %v58_v47 }
  0x49   :  { %459 = vmatpush1.bf16.msra.mxu0 %v1097_v18  ;;  %500 = vmatpush1.bf16.msra.mxu1 %v1098_v19  ;;  %v1146_v53 = vld [vmem:[#allocation5 + $0x188] ss:$16 sps:$4 sm:$0xff]   ;;  %v1149_v55 = vld [vmem:[#allocation5 + $0x1ac] ss:$16 sps:$4 sm:$0xff]   ;;  %v1151_v56 = vld [vmem:[#allocation5 + $0x1a0] ss:$16 sps:$4 sm:$0xff]  }
  0x4a   :  { %460 = vmatprep.subr.bf16.mxu0 %v1099_v20  ;;  %501 = vmatprep.subr.bf16.mxu1 %v1101_v21  ;;  %v1152_v57 = vld [vmem:[#allocation5 + $0x1a8] ss:$16 sps:$4 sm:$0xff]   ;;  %v1153_v58 = vld [vmem:[#allocation5 + $0x1c4] ss:$16 sps:$4 sm:$0xff]   ;;  %v1155_v59 = vld [vmem:[#allocation5 + $0x1cc] ss:$16 sps:$4 sm:$0xff]  }
  0x4b   :  { %482 = vmatprep.mubr.bf16.mxu0 %v919_v49  ;;  %523 = vmatprep.mubr.bf16.mxu1 %v919_v49  ;;  %v1157_v60 = vld [vmem:[#allocation5 + $0x1c0] ss:$16 sps:$4 sm:$0xff]   ;;  %v1158_v61 = vld [vmem:[#allocation5 + $0x1c8] ss:$16 sps:$4 sm:$0xff]   ;;  %v1159_v62 = vld [vmem:[#allocation5 + $0x1e4] ss:$16 sps:$4 sm:$0xff]  }
  0x4c   :  { %v1161_v63 = vld [vmem:[#allocation5 + $0x1ec] ss:$16 sps:$4 sm:$0xff]   ;;  %v1163_v0 = vld [vmem:[#allocation5 + $0x1e0] ss:$16 sps:$4 sm:$0xff]   ;;  %v1164_v1 = vld [vmem:[#allocation5 + $0x1e8] ss:$16 sps:$4 sm:$0xff]  }
  0x4d   :  { %461 = vmatpush1.bf16.msra.mxu0 %v1103_v22  ;;  %502 = vmatpush1.bf16.msra.mxu1 %v1104_v23  ;;  %v1167_v2 = vld [vmem:[#allocation7 + $0x40] sm:$0xff]   ;;  %v1171_v7 = vld [vmem:[#allocation7 + $0x48] sm:$0xff]   ;;  %v1175_v11 = vld [vmem:[#allocation7 + $0x50] sm:$0xff]  }
  0x4e   :  { %462 = vmatprep.subr.bf16.mxu0 %v1105_v24  ;;  %503 = vmatprep.subr.bf16.mxu1 %v1107_v25  ;;  %v1168_v3 = vld [vmem:[#allocation7 + $0xc0] sm:$0xff]   ;;  %v1172_v8 = vld [vmem:[#allocation7 + $0xc8] sm:$0xff]   ;;  %v1176_v12 = vld [vmem:[#allocation7 + $0xd0] sm:$0xff]  }
  0x4f   :  { %v1169_v4 = vld [vmem:[#allocation7] sm:$0xff]   ;;  %v1173_v9 = vld [vmem:[#allocation7 + $0x8] sm:$0xff]   ;;  %v1177_v13 = vld [vmem:[#allocation7 + $0x10] sm:$0xff]  }
  0x50   :  { %v1170_v6 = vld [vmem:[#allocation7 + $0x80] sm:$0xff]   ;;  %v1174_v10 = vld [vmem:[#allocation7 + $0x88] sm:$0xff]   ;;  %v1178_v14 = vld [vmem:[#allocation7 + $0x90] sm:$0xff]  }
  0x51   :  { %463 = vmatpush1.bf16.msra.mxu0 %v1109_v26  ;;  %504 = vmatpush1.bf16.msra.mxu1 %v1110_v27  ;;  %v1179_v15 = vld [vmem:[#allocation7 + $0x58] sm:$0xff]   ;;  %v1183_v19 = vld [vmem:[#allocation7 + $0x60] sm:$0xff]   ;;  %v1187_v23 = vld [vmem:[#allocation7 + $0x68] sm:$0xff]  }
  0x52   :  { %464 = vmatprep.subr.bf16.mxu0 %v1111_v28  ;;  %505 = vmatprep.subr.bf16.mxu1 %v1113_v29  ;;  %v1180_v16 = vld [vmem:[#allocation7 + $0xd8] sm:$0xff]   ;;  %v1184_v20 = vld [vmem:[#allocation7 + $0xe0] sm:$0xff]   ;;  %v1188_v24 = vld [vmem:[#allocation7 + $0xe8] sm:$0xff]  }
  0x53   :  { %v1181_v17 = vld [vmem:[#allocation7 + $0x18] sm:$0xff]   ;;  %v1185_v21 = vld [vmem:[#allocation7 + $0x20] sm:$0xff]   ;;  %v1189_v25 = vld [vmem:[#allocation7 + $0x28] sm:$0xff]  }
  0x54   :  { %v1182_v18 = vld [vmem:[#allocation7 + $0x98] sm:$0xff]   ;;  %v1186_v22 = vld [vmem:[#allocation7 + $0xa0] sm:$0xff]   ;;  %v1190_v26 = vld [vmem:[#allocation7 + $0xa8] sm:$0xff]  }
  0x55   :  { %465 = vmatpush1.bf16.msra.mxu0 %v1115_v30  ;;  %506 = vmatpush1.bf16.msra.mxu1 %v1116_v31  ;;  %v1191_v27 = vld [vmem:[#allocation7 + $0x70] sm:$0xff]   ;;  %v1195_v31 = vld [vmem:[#allocation7 + $0x78] sm:$0xff]  }
  0x56   :  { %466 = vmatprep.subr.bf16.mxu0 %v1117_v32  ;;  %507 = vmatprep.subr.bf16.mxu1 %v1119_v33  ;;  %v1192_v28 = vld [vmem:[#allocation7 + $0xf0] sm:$0xff]   ;;  %v1196_v32 = vld [vmem:[#allocation7 + $0xf8] sm:$0xff]  }
  0x57   :  { %v1193_v29 = vld [vmem:[#allocation7 + $0x30] sm:$0xff]   ;;  %v1197_v33 = vld [vmem:[#allocation7 + $0x38] sm:$0xff]  }
  0x58   :  { %v1194_v30 = vld [vmem:[#allocation7 + $0xb0] sm:$0xff]   ;;  %v984_v49 = vld [vmem:[%s1382_s3] ss:$0 sm:$0xff]  ;;  %s1302_s3 = smov [#allocation8]  }
  0x59   :  { %467 = vmatpush1.bf16.msra.mxu0 %v1121_v34  ;;  %508 = vmatpush1.bf16.msra.mxu1 %v1122_v35  ;;  %v1198_v34 = vld [vmem:[#allocation7 + $0xb8] sm:$0xff]   ;;  %s908_s28 = sshll.u32 %s1302_s3, 4  ;;  %s909_s28 = int_to_ptr.vmem [resolvable:$true] %s908_s28 }
  0x5a   :  { %468 = vmatprep.subr.bf16.mxu0 %v1123_v36  ;;  %509 = vmatprep.subr.bf16.mxu1 %v1125_v37  ;;  %s1267_s29 = scalar_lea.vmem %s909_s28, 64  ;;  %p1272_p11 = scmp.lt.s32.totalorder %s909_s28, %s909_s28 }
  0x5b   :  { %p1268_p10 = scmp.ne.s32.totalorder %s909_s28, %s1267_s29  ;;  %p1273_p12 = scmp.lt.s32.totalorder %s1267_s29, %s1267_s29 }
  0x5d   :  { %469 = vmatpush1.bf16.msra.mxu0 %v1127_v38  ;;  %510 = vmatpush1.bf16.msra.mxu1 %v1128_v39  ;;  %p1274_p13 = por %p1273_p12, %p1272_p11 }
  0x5e   :  { %470 = vmatprep.subr.bf16.mxu0 %v1129_v40  ;;  %511 = vmatprep.subr.bf16.mxu1 %v1131_v41 }
  0x5f   :  { %p1275_p0 = pnand %p1274_p13, %p1268_p10 }
  0x61   :  { %471 = vmatpush1.bf16.msra.mxu0 %v1133_v42  ;;  %512 = vmatpush1.bf16.msra.mxu1 %v1134_v43 }
  0x62   :  { %472 = vmatprep.subr.bf16.mxu0 %v1135_v44  ;;  %513 = vmatprep.subr.bf16.mxu1 %v1137_v45 }
  0x65   :  { %473 = vmatpush1.bf16.msra.mxu0 %v1139_v46  ;;  %514 = vmatpush1.bf16.msra.mxu1 %v1140_v48 }
  0x66   :  { %474 = vmatprep.subr.bf16.mxu0 %v1141_v50  ;;  %515 = vmatprep.subr.bf16.mxu1 %v1143_v51 }
  0x69   :  { %475 = vmatpush1.bf16.msra.mxu0 %v1145_v52  ;;  %516 = vmatpush1.bf16.msra.mxu1 %v1146_v53 }
  0x6a   :  { %476 = vmatprep.subr.bf16.mxu0 %v1147_v54  ;;  %517 = vmatprep.subr.bf16.mxu1 %v1149_v55 }
  0x6d   :  { %477 = vmatpush1.bf16.msra.mxu0 %v1151_v56  ;;  %518 = vmatpush1.bf16.msra.mxu1 %v1152_v57 }
  0x6e   :  { %478 = vmatprep.subr.bf16.mxu0 %v1153_v58  ;;  %519 = vmatprep.subr.bf16.mxu1 %v1155_v59 }
  0x71   :  { %479 = vmatpush1.bf16.msra.mxu0 %v1157_v60  ;;  %520 = vmatpush1.bf16.msra.mxu1 %v1158_v61 }
  0x72   :  { %480 = vmatprep.subr.bf16.mxu0 %v1159_v62  ;;  %521 = vmatprep.subr.bf16.mxu1 %v1161_v63 }
  0x75   :  { %481 = vmatpush1.bf16.msra.mxu0 %v1163_v0  ;;  %522 = vmatpush1.bf16.msra.mxu1 %v1164_v1 }
  0x76   :  { %1017 = vmatprep.subr.bf16.mxu0 %v1167_v2  ;;  %1039 = vmatprep.subr.bf16.mxu1 %v1168_v3 }
  0x78   :  { %483 = vmatmul.mubr.bf16.vlgmr.msra.gmra.mrb[0].mxu0 %v918_v5  ;;  %524 = vmatmul.mubr.bf16.vlgmr.msra.gmra.mrb[0].mxu1 %v918_v5 }
  0x79   :  { %1018 = vmatpush3.bf16.msra.mxu0 %v1169_v4  ;;  %1040 = vmatpush3.bf16.msra.mxu1 %v1170_v6 }
  0x7a   :  { %1019 = vmatprep.subr.bf16.mxu0 %v1171_v7  ;;  %1041 = vmatprep.subr.bf16.mxu1 %v1172_v8 }
  0x7d   :  { %1020 = vmatpush3.bf16.msra.mxu0 %v1173_v9  ;;  %1042 = vmatpush3.bf16.msra.mxu1 %v1174_v10 }
  0x7e   :  { %1021 = vmatprep.subr.bf16.mxu0 %v1175_v11  ;;  %1043 = vmatprep.subr.bf16.mxu1 %v1176_v12 }
  0x81   :  { %1022 = vmatpush3.bf16.msra.mxu0 %v1177_v13  ;;  %1044 = vmatpush3.bf16.msra.mxu1 %v1178_v14 }
  0x82   :  { %1023 = vmatprep.subr.bf16.mxu0 %v1179_v15  ;;  %1045 = vmatprep.subr.bf16.mxu1 %v1180_v16 }
  0x85   :  { %1024 = vmatpush3.bf16.msra.mxu0 %v1181_v17  ;;  %1046 = vmatpush3.bf16.msra.mxu1 %v1182_v18 }
  0x86   :  { %1025 = vmatprep.subr.bf16.mxu0 %v1183_v19  ;;  %1047 = vmatprep.subr.bf16.mxu1 %v1184_v20 }
  0x89   :  { %1026 = vmatpush3.bf16.msra.mxu0 %v1185_v21  ;;  %1048 = vmatpush3.bf16.msra.mxu1 %v1186_v22 }
  0x8a   :  { %1027 = vmatprep.subr.bf16.mxu0 %v1187_v23  ;;  %1049 = vmatprep.subr.bf16.mxu1 %v1188_v24 }
  0x8d   :  { %1028 = vmatpush3.bf16.msra.mxu0 %v1189_v25  ;;  %1050 = vmatpush3.bf16.msra.mxu1 %v1190_v26 }
  0x8e   :  { %1029 = vmatprep.subr.bf16.mxu0 %v1191_v27  ;;  %1051 = vmatprep.subr.bf16.mxu1 %v1192_v28 }
  0x91   :  { %1030 = vmatpush3.bf16.msra.mxu0 %v1193_v29  ;;  %1052 = vmatpush3.bf16.msra.mxu1 %v1194_v30 }
  0x92   :  { %1031 = vmatprep.subr.bf16.mxu0 %v1195_v31  ;;  %1053 = vmatprep.subr.bf16.mxu1 %v1196_v32 }
  0x95   :  { %1032 = vmatpush3.bf16.msra.mxu0 %v1197_v33  ;;  %1054 = vmatpush3.bf16.msra.mxu1 %v1198_v34 }
 0x14b   :  { %v484_v35 = vpop.f32.mrb[0].mxu0  ;;  %v525_v36 = vpop.f32.mrb[0].mxu1 }
 0x14c   :  { %v534_v37 = vpack.c.bf16 %v525_v36, %v525_v36  ;;  %v486_v38 = vpop.f32.mrb[1].mxu0  ;;  %v527_v39 = vpop.f32.mrb[1].mxu1  ;;  %v532_v44 = vpack.c.bf16 %v484_v35, %v484_v35 }
 0x14d   :  { %v533_v40 = vpack.c.bf16 %v486_v38, %v486_v38  ;;  %v535_v41 = vpack.c.bf16 %v527_v39, %v527_v39  ;;  %v488_v42 = vpop.f32.mrb[2].mxu0  ;;  %v529_v43 = vpop.f32.mrb[2].mxu1 }
 0x14e   :  { %v489_v45 = vpop.f32.mrb[3].mxu0  ;;  %v530_v46 = vpop.f32.mrb[3].mxu1 }
 0x14f   :  { %831 = vmatprep.mubr.bf16.mxu0 %v533_v40  ;;  %871 = vmatprep.mubr.bf16.mxu1 %v535_v41 }
 0x150   :  { %832 = vmatmul.mubr.bf16.vlgmr.msra.gmra.mrb[4].mxu0 %v532_v44  ;;  %872 = vmatmul.mubr.bf16.vlgmr.msra.gmra.mrb[4].mxu1 %v534_v37 }
 0x223   :  { %v1033_v47 = vpop.f32.mrb[4].mxu0  ;;  %v1055_v48 = vpop.f32.mrb[4].mxu1 }
 0x224   :  { %v1034_v50 = vpop.f32.mrb[5].mxu0  ;;  %v1056_v51 = vpop.f32.mrb[5].mxu1 }
 0x225   :  { %v1035_v52 = vadd.f32 %v1034_v50, %v1033_v47  ;;  %v1057_v53 = vadd.f32 %v1056_v51, %v1055_v48  ;;  %v1036_v54 = vpop.f32.mrb[6].mxu0  ;;  %v1058_v55 = vpop.f32.mrb[6].mxu1 }
 0x226   :  { %v1037_v56 = vpop.f32.mrb[7].mxu0  ;;  %v1059_v57 = vpop.f32.mrb[7].mxu1 }
 0x227   :  { %v834_v58 = vadd.f32 %v1035_v52, %v984_v49 }
 0x229   :  { %v874_v59 = vadd.f32 %v1057_v53, %v834_v58 }
 0x22b   :  { %v879_v60 = vrot.slane %v874_v59, 4 }
 0x22d   :  { %v880_v61 = vadd.f32 %v879_v60, %v874_v59 }
 0x22f   :  { %v881_v62 = vrot.slane %v880_v61, 2 }
 0x231   :  { %v882_v63 = vadd.f32 %v881_v62, %v880_v61 }
 0x233   :  { %v883_v0 = vrot.slane %v882_v63, 1 }
 0x235   :  { %v884_v1 = vadd.f32 %v883_v0, %v882_v63 }
 0x237   :  { %v886_v2 = vmul.f32 0.125, %v884_v1 }
 0x239   :  { %v887_v3 = vsub.f32 %v874_v59, %v886_v2 }
 0x23b   :  { %v888_v4 = vmul.f32 %v887_v3, %v887_v3 }
 0x23d   :  { %v889_v5 = vrot.slane %v888_v4, 4 }
 0x23f   :  { %v890_v6 = vadd.f32 %v889_v5, %v888_v4 }
 0x241   :  { %v891_v7 = vrot.slane %v890_v6, 2 }
 0x243   :  { %v892_v8 = vadd.f32 %v891_v7, %v890_v6 }
 0x245   :  { %v893_v9 = vrot.slane %v892_v8, 1 }
 0x247   :  { %v894_v10 = vadd.f32 %v893_v9, %v892_v8 }
 0x249   :  { %v895_v11 = vmul.f32 0.125, %v894_v10 }
 0x24b   :  { %v896_v12 = vadd.f32 1e-05, %v895_v11 }
 0x24d   :  { %1199 = vrsqrt.f32 %v896_v12 }
 0x257   :  { %v1200_v13 = vpop.eup %1199 }
 0x258   :  { %v898_v14 = vmul.f32 %v1200_v13, %v887_v3 }
 0x25a   :  { %v899_v15 = vmax.f32 %v898_v14, 0.0 }
 0x25c   :  { %v900_v16 = vpack.c.bf16 %v899_v15, %v899_v15 }
 0x25e   :  { %901 = vst [vmem:[#allocation8] sm:$0xf] %v900_v16 }
 0x25f   :  { %1278 = shalt.err (!%p1275_p0)
}
 0x260   :  { %s1279_s6 = scalar_lea.hbm %s1383_s4, 64 }
 0x261   :  { %p1280_p1 = scmp.ne.s32.totalorder %s1383_s4, %s1279_s6  ;;  %p1283_p2 = scmp.lt.u32.totalorder %s1279_s6, %s1383_s4 }
 0x263   :  { %p1285_p3 = pnand %p1283_p2, %p1280_p1 }
 0x265   :  { %1288 = shalt.err (!%p1285_p3)
}
 0x266   :  { %911 = dma.vmem_to_hbm [thread:$0]  %s909_s28, 64, %s1383_s4, [#allocation4]  }
 0x267   :  { %1293 = dma.done.wait [#allocation4], 64  }
 0x268   :  { %1294 = vsyncadd [#allocation4], 4294967232 }
 0x269   :  { %915 = vsyncpa [#allocation3], 1 }
 0x26a   :  { %916 = vsyncpa [#allocation6], 1 }
 0x26b   :  { %917 = vsyncpa [#allocation4], 1 }

</bundles_post_ra>
